<compile_context>
chip_gen: v7x
topology: tpu7x:2x2x1
jax: 0.10.0
libtpu: 0.0.40
codegen_flags: <defaults>
</compile_context>

<pallas_src>
import functools

import jax
import jax.numpy as jnp
from jax.experimental import pallas as pl
from jax.experimental.pallas import tpu as pltpu


def _gap_kernel(x_ref, o_ref, acc_ref, *, inv_total, total, chunk, ragged):
    """x_ref: (tc, chunk) slab of the flattened input; o_ref/acc_ref: (tc, 1)."""
    k = pl.program_id(1)

    @pl.when(k == 0)
    def _():
        acc_ref[...] = jnp.zeros_like(acc_ref)

    x = x_ref[...].astype(jnp.float32)
    if ragged:
        # The last reduction chunk runs past D*H*W: those lanes hold
        # unspecified data, so select (not multiply) them to zero.
        lane = jax.lax.broadcasted_iota(jnp.int32, x.shape, 1)
        x = jnp.where(k * chunk + lane < total, x, 0.0)

    # Lane-axis reduce: mostly elementwise vreg adds (VPU) with a single
    # amortized cross-lane collapse; result lands per-channel per-sublane.
    acc_ref[...] += jnp.sum(x, axis=1, keepdims=True)

    @pl.when(k == pl.num_programs(1) - 1)
    def _():
        o_ref[...] = (acc_ref[...] * inv_total).astype(o_ref.dtype)


def _round_down(v, m):
    return (v // m) * m


def _round_up(v, m):
    return ((v + m - 1) // m) * m


def global_avg_pool3d(x, *, target_block_bytes=4 << 20):
    """x: (C, D, H, W) -> (C, 1, 1, 1), mean over (D, H, W)."""
    assert x.ndim == 4, "expects unbatched (C, D, H, W) input"
    C, D, H, W = x.shape
    total = D * H * W
    itemsize = jnp.dtype(x.dtype).itemsize

    # Native sublane packing: f32 (8,128), bf16 (16,128), int8/fp8 (32,128).
    sub = {4: 8, 2: 16, 1: 32}.get(itemsize, 8)
    budget_elems = max(sub * 128, target_block_bytes // itemsize)

    # ---- pick (tc, chunk); only free reshapes, never pad HBM -------------
    if C * total <= budget_elems:
        # Whole array in a single block: one grid step, no masking.
        tc, chunk = C, total
    elif total * sub <= budget_elems:
        # Full spatial extent per block (no masking); tile channels.
        chunk = total
        tc = min(_round_down(budget_elems // total, sub), _round_up(C, sub))
    else:
        # Tile the spatial axis too; mask the ragged tail in-kernel.
        tc = C if C < sub else sub
        chunk = max(128, _round_down(budget_elems // tc, 128))
        chunk = min(chunk, _round_up(total, 128))

    n_chan = pl.cdiv(C, tc)
    n_chunks = pl.cdiv(total, chunk)
    ragged = (total % chunk) != 0

    x2 = x.reshape(C, total)  # contiguous row-major -> free, no HBM copy

    # VMEM: double-buffered input block + f32/iota/mask temporaries + slack.
    block_bytes = tc * chunk * itemsize
    block_f32 = tc * chunk * 4
    vmem_limit = int(
        min(max(2 * block_bytes + 4 * block_f32 + (4 << 20), 16 << 20), 48 << 20)
    )

    kernel = functools.partial(
        _gap_kernel,
        inv_total=1.0 / float(total),
        total=total,
        chunk=chunk,
        ragged=ragged,
    )

    out2d = pl.pallas_call(
        kernel,
        out_shape=jax.ShapeDtypeStruct((C, 1), x.dtype),
        grid_spec=pltpu.PrefetchScalarGridSpec(
            num_scalar_prefetch=0,
            grid=(n_chan, n_chunks),
            in_specs=[pl.BlockSpec((tc, chunk), lambda c, k: (c, k))],
            out_specs=pl.BlockSpec((tc, 1), lambda c, k: (c, 0)),
            scratch_shapes=[pltpu.VMEM((tc, 1), jnp.float32)],
        ),
        # "parallel" on the channel axis lets multi-TensorCore chips (v7x)
        # shard channel tiles; harmless no-op on single-TC v5e/v6e.
        compiler_params=pltpu.CompilerParams(
            dimension_semantics=("parallel", "arbitrary"),
            vmem_limit_bytes=vmem_limit,
        ),
    )(x2)

    return out2d.reshape(C, 1, 1, 1)


if __name__ == "__main__":
    key = jax.random.PRNGKey(0)
    k0, k1, k2, k3 = jax.random.split(key, 4)

    def check(x, **kw):
        out = jax.block_until_ready(global_avg_pool3d(x, **kw))
        ref = jnp.mean(x.astype(jnp.float32), axis=(1, 2, 3), keepdims=True)
        assert out.shape == (x.shape[0], 1, 1, 1), out.shape
        assert jnp.allclose(out.astype(jnp.float32), ref, atol=1e-4, rtol=1e-4), (
            out,
            ref,
        )

    # Small shape consistent with the module's forward: (C, D, H, W).
    check(jax.random.normal(k0, (4, 8, 16, 16), jnp.float32))   # single block
    # Awkward 3x7x7 spatial (not a multiple of 128) — still a single,
    # un-padded, un-masked block since chunk == D*H*W.
    check(jax.random.normal(k1, (16, 3, 7, 7), jnp.float32))
    # Force the channel-tiled / full-spatial-chunk path.
    check(jax.random.normal(k2, (64, 10, 10, 10), jnp.float32),
          target_block_bytes=64 << 10)
    # Force the spatially-chunked path with a ragged, in-kernel-masked tail.
    check(jax.random.normal(k3, (8, 4, 33, 31), jnp.float32),
          target_block_bytes=64 << 10)

    print("KERNEL_OK")
</pallas_src>

<mosaic_0001>
module attributes {stable_mosaic.version = 11 : i64} {
  func.func @_gap_kernel(%arg0: i32, %arg1: i32, %arg2: memref<4x2048xf32, #tpu.memory_space<vmem>>, %arg3: memref<4x1xf32, #tpu.memory_space<vmem>>, %arg4: memref<4x1xf32, #tpu.memory_space<vmem>>) attributes {dimension_semantics = [#tpu.dimension_semantics<parallel>, #tpu.dimension_semantics<arbitrary>], iteration_bounds = array<i64: 1, 1>, scalar_prefetch = 0 : i64, scratch_operands = 1 : i64, tpu.core_type = #tpu.core_type<tc>, window_params = [{transform_indices = @transform_0, window_bounds = array<i64: 4, 2048>}, {transform_indices = @transform_1, window_bounds = array<i64: 4, 1>}]} {
    %c0_i32 = arith.constant 0 : i32
    %0 = arith.cmpi eq, %arg1, %c0_i32 : i32
    %1 = arith.extui %0 : i1 to i32
    %c0_i32_0 = arith.constant 0 : i32
    %2 = arith.cmpi ne, %1, %c0_i32_0 : i32
    scf.if %2 {
      %cst_8 = arith.constant 0.000000e+00 : f32
      %12 = vector.broadcast %cst_8 : f32 to vector<4x1xf32>
      %c0_9 = arith.constant 0 : index
      %c0_10 = arith.constant 0 : index
      %13 = vector.load %arg4[%c0_9, %c0_10] : memref<4x1xf32, #tpu.memory_space<vmem>>, vector<4x1xf32>
      tpu.vector_store %arg4[%c0_9, %c0_10], %12 {strides = array<i32>} : memref<4x1xf32, #tpu.memory_space<vmem>>, vector<4x1xf32>,
    } else {
    }
    %c0 = arith.constant 0 : index
    %c0_1 = arith.constant 0 : index
    %3 = vector.load %arg2[%c0, %c0_1] : memref<4x2048xf32, #tpu.memory_space<vmem>>, vector<4x2048xf32>
    %c0_2 = arith.constant 0 : index
    %c0_3 = arith.constant 0 : index
    %4 = vector.load %arg4[%c0_2, %c0_3] : memref<4x1xf32, #tpu.memory_space<vmem>>, vector<4x1xf32>
    %cst = arith.constant dense<0.000000e+00> : vector<4xf32>
    %5 = vector.multi_reduction <add>, %3, %cst [1] : vector<4x2048xf32> to vector<4xf32>
    %6 = vector.shape_cast %5 : vector<4xf32> to vector<4x1xf32>
    %7 = arith.addf %4, %6 : vector<4x1xf32>
    %c0_4 = arith.constant 0 : index
    %c0_5 = arith.constant 0 : index
    %8 = vector.load %arg4[%c0_4, %c0_5] : memref<4x1xf32, #tpu.memory_space<vmem>>, vector<4x1xf32>
    tpu.vector_store %arg4[%c0_4, %c0_5], %7 {strides = array<i32>} : memref<4x1xf32, #tpu.memory_space<vmem>>, vector<4x1xf32>,
    %c0_i32_6 = arith.constant 0 : i32
    %9 = arith.cmpi eq, %arg1, %c0_i32_6 : i32
    %10 = arith.extui %9 : i1 to i32
    %c0_i32_7 = arith.constant 0 : i32
    %11 = arith.cmpi ne, %10, %c0_i32_7 : i32
    scf.if %11 {
      %c0_8 = arith.constant 0 : index
      %c0_9 = arith.constant 0 : index
      %12 = vector.load %arg4[%c0_8, %c0_9] : memref<4x1xf32, #tpu.memory_space<vmem>>, vector<4x1xf32>
      %cst_10 = arith.constant 4.8828125E-4 : f32
      %13 = vector.broadcast %cst_10 : f32 to vector<4x1xf32>
      %14 = arith.mulf %12, %13 : vector<4x1xf32>
      %c0_11 = arith.constant 0 : index
      %c0_12 = arith.constant 0 : index
      %15 = vector.load %arg3[%c0_11, %c0_12] : memref<4x1xf32, #tpu.memory_space<vmem>>, vector<4x1xf32>
      tpu.vector_store %arg3[%c0_11, %c0_12], %14 {strides = array<i32>} : memref<4x1xf32, #tpu.memory_space<vmem>>, vector<4x1xf32>,
    } else {
    }
    return
  }
  func.func @transform_0(%arg0: i32, %arg1: i32) -> (i32, i32) {
    %c0_i32 = arith.constant 0 : i32
    return %arg0, %arg1 : i32, i32
  }
  func.func @transform_1(%arg0: i32, %arg1: i32) -> (i32, i32) {
    %c0_i32 = arith.constant 0 : i32
    %c0_i32_0 = arith.constant 0 : i32
    return %arg0, %c0_i32 : i32, i32
  }
}

</mosaic_0001>

<bundles_post_ra>
// kernel: tpu_custom_call.1
= control target key start
LH: loop header
LB: loop body
LE: loop exit
PB: predicated region body
PF: predicated region fallthrough
CT: control target
= control target key end

     0   :  { %6 = vsyncpa [#allocation4], 0  ;;  %s141_s6 = smov [#allocation3]   ;;  %s187_s0 = inlined_call_operand.hbm [shape: f32[4,2048], index: 0, kind: input, shape index: {}]   ;;  %s188_s1 = inlined_call_operand.vmem [shape: f32[4,1], index: 1, kind: output, shape index: {}]  }
   0x1   :  { %s13_s7 = sshll.u32 %s141_s6, 4  ;;  %s117_s10 = scalar_lea.hbm %s187_s0, 1024  ;;  %s14_s7 = int_to_ptr.vmem [resolvable:$true] %s13_s7 }
   0x2   :  { %p118_p0 = scmp.ne.s32.totalorder %s187_s0, %s117_s10  ;;  %p121_p1 = scmp.lt.u32.totalorder %s117_s10, %s187_s0 }
   0x4   :  { %p123_p2 = pnand %p121_p1, %p118_p0 }
   0x6   :  { %126 = shalt.err (!%p123_p2)
}
   0x7   :  { %s127_s15 = scalar_lea.vmem %s14_s7, 1024  ;;  %p132_p4 = scmp.lt.s32.totalorder %s14_s7, %s14_s7 }
   0x8   :  { %p128_p3 = scmp.ne.s32.totalorder %s14_s7, %s127_s15  ;;  %p133_p5 = scmp.lt.s32.totalorder %s127_s15, %s127_s15 }
   0xa   :  { %p134_p6 = por %p133_p5, %p132_p4 }
   0xc   :  { %p135_p7 = pnand %p134_p6, %p128_p3 }
   0xe   :  { %138 = shalt.err (!%p135_p7)
}
   0xf   :  { %16 = dma.hbm_to_vmem [thread:$0]  %s187_s0, 1024, %s14_s7, [#allocation4]  }
  0x10   :  { %139 = dma.done.wait [#allocation4], 1024  }
  0x11   :  { %140 = vsyncadd [#allocation4], 4294966272  ;;  %vm24_vm0 = vcmask 3072   ;;  %v142_v0 = vmov 0.0   ;;  %vm59_vm1 = vcmask 1043456   ;;  %v26_v1 = vld [vmem:[#allocation3] sm:$0xff] }
  0x12   :  { %25 = vst.msk [vmem:[#allocation2] sm:$0xf] %vm24_vm0, %v142_v0  ;;  %v27_v2 = vld [vmem:[#allocation3 + $0x8] sm:$0xff]  ;;  %v43_v3 = vcombine.high %v26_v1, %v26_v1  ;;  %v60_v5 = vsel %vm59_vm1, %v26_v1, 0.0  ;;  %v28_v6 = vld [vmem:[#allocation3 + $0x10] sm:$0xff]  ;;  %v29_v12 = vld [vmem:[#allocation3 + $0x18] sm:$0xff] }
  0x13   :  { %v44_v4 = vcombine.high %v27_v2, %v27_v2  ;;  %v63_v8 = vsel %vm59_vm1, %v27_v2, 0.0  ;;  %v45_v10 = vcombine.high %v28_v6, %v28_v6  ;;  %v67_v14 = vsel %vm59_vm1, %v28_v6, 0.0  ;;  %v30_v18 = vld [vmem:[#allocation3 + $0x20] sm:$0xff]  ;;  %v31_v24 = vld [vmem:[#allocation3 + $0x28] sm:$0xff]  ;;  %v32_v30 = vld [vmem:[#allocation3 + $0x30] sm:$0xff] }
  0x14   :  { %v61_v7 = vsel %vm59_vm1, %v43_v3, 0.0  ;;  %v46_v16 = vcombine.high %v29_v12, %v29_v12  ;;  %v71_v20 = vsel %vm59_vm1, %v29_v12, 0.0  ;;  %v47_v22 = vcombine.high %v30_v18, %v30_v18  ;;  %v33_v36 = vld [vmem:[#allocation3 + $0x38] sm:$0xff] }
  0x15   :  { %v62_v9 = vadd.f32 %v61_v7, %v60_v5  ;;  %v65_v11 = vsel %vm59_vm1, %v44_v4, 0.0  ;;  %v69_v17 = vsel %vm59_vm1, %v45_v10, 0.0  ;;  %v75_v26 = vsel %vm59_vm1, %v30_v18, 0.0 }
  0x16   :  { %v73_v23 = vsel %vm59_vm1, %v46_v16, 0.0  ;;  %v48_v28 = vcombine.high %v31_v24, %v31_v24  ;;  %v77_v29 = vsel %vm59_vm1, %v47_v22, 0.0  ;;  %v79_v32 = vsel %vm59_vm1, %v31_v24, 0.0 }
  0x17   :  { %v64_v13 = vadd.f32 %v63_v8, %v62_v9  ;;  %v49_v34 = vcombine.high %v32_v30, %v32_v30  ;;  %v83_v38 = vsel %vm59_vm1, %v32_v30, 0.0  ;;  %v50_v40 = vcombine.high %v33_v36, %v33_v36 }
  0x18   :  { %v81_v35 = vsel %vm59_vm1, %v48_v28, 0.0  ;;  %v87_v43 = vsel %vm59_vm1, %v33_v36, 0.0 }
  0x19   :  { %v66_v15 = vadd.f32 %v65_v11, %v64_v13  ;;  %v85_v41 = vsel %vm59_vm1, %v49_v34, 0.0  ;;  %v89_v45 = vsel %vm59_vm1, %v50_v40, 0.0  ;;  %v34_v48 = vld [vmem:[#allocation2] sm:$0xf] }
  0x1b   :  { %v68_v19 = vadd.f32 %v67_v14, %v66_v15 }
  0x1d   :  { %v70_v21 = vadd.f32 %v69_v17, %v68_v19 }
  0x1f   :  { %v72_v25 = vadd.f32 %v71_v20, %v70_v21 }
  0x21   :  { %v74_v27 = vadd.f32 %v73_v23, %v72_v25 }
  0x23   :  { %v76_v31 = vadd.f32 %v75_v26, %v74_v27 }
  0x25   :  { %v78_v33 = vadd.f32 %v77_v29, %v76_v31 }
  0x27   :  { %v80_v37 = vadd.f32 %v79_v32, %v78_v33 }
  0x29   :  { %v82_v39 = vadd.f32 %v81_v35, %v80_v37 }
  0x2b   :  { %v84_v42 = vadd.f32 %v83_v38, %v82_v39 }
  0x2d   :  { %v86_v44 = vadd.f32 %v85_v41, %v84_v42 }
  0x2f   :  { %v88_v46 = vadd.f32 %v87_v43, %v86_v44 }
  0x31   :  { %v90_v47 = vadd.f32 %v89_v45, %v88_v46 }
  0x33   :  { %91 = vadd.xlane.f32.xlu0 %v90_v47 }
  0xc0   :  { %v92_v49 = vpop.xlane.xlu0 %91 }
  0xc1   :  { %v93_v50 = vadd.f32 %v92_v49, %v34_v48 }
  0xc3   :  { %95 = vst.msk [vmem:[#allocation2] sm:$0xf] %vm24_vm0, %v93_v50 }
  0xca   :  { %v99_v51 = vld [vmem:[#allocation2] sm:$0xf] }
  0xcb   :  { %v100_v52 = vmul.f32 0.00048828125, %v99_v51 }
  0xcd   :  { %101 = vst.msk [vmem:[%s188_s1] sm:$0xf] %vm24_vm0, %v100_v52 }
  0xce   :  { %106 = vsyncpa [#allocation4], 1 }

</bundles_post_ra>
